<compile_context>
chip_gen: v5e
topology: v5e:2x2
jax: 0.10.0
libtpu: 0.0.40
codegen_flags: <defaults>
</compile_context>

<pallas_src>
import functools

import jax
import jax.numpy as jnp
from jax.experimental import pallas as pl
from jax.experimental.pallas import tpu as pltpu


def _channel_attention_kernel(x_ref, w1_ref, b1_ref, w2_ref, b2_ref, o_ref,
                              sum_acc, max_acc, *, l_total, tl, lane_w,
                              need_mask):
    # x_ref:   (tb, C, tl) current L-chunk (native dtype)
    # w1: (C, H), b1: (1, H), w2: (H, C), b2: (1, C)
    # o_ref:   (tb, C) output block (written on last L step only)
    # sum_acc / max_acc: (tb, C, lane_w) f32 lane-resident accumulators
    l = pl.program_id(1)
    last = pl.num_programs(1) - 1
    n_groups = tl // lane_w

    @pl.when(l == 0)
    def _init():
        sum_acc[...] = jnp.zeros_like(sum_acc)
        max_acc[...] = jnp.full_like(max_acc, -jnp.inf)

    def accumulate(masked):
        # Single pass over the loaded chunk: each lane_w-wide sub-slice is
        # cast to f32 once and feeds both accumulators (pure VPU add/max;
        # no cross-lane reduce in the hot loop).
        for g in range(n_groups):
            sub = x_ref[:, :, g * lane_w:(g + 1) * lane_w].astype(jnp.float32)
            if masked:
                pos = (l * tl + g * lane_w
                       + jax.lax.broadcasted_iota(jnp.int32, (1, 1, lane_w), 2))
                valid = pos < l_total
                sum_acc[...] += jnp.where(valid, sub, 0.0)
                max_acc[...] = jnp.maximum(max_acc[...],
                                           jnp.where(valid, sub, -jnp.inf))
            else:
                sum_acc[...] += sub
                max_acc[...] = jnp.maximum(max_acc[...], sub)

    if need_mask:
        # Only the final L step can contain out-of-range lanes; every other
        # step takes the unmasked (cheaper) path.
        @pl.when(l != last)
        def _acc_main():
            accumulate(False)

        @pl.when(l == last)
        def _acc_tail():
            accumulate(True)
    else:
        accumulate(False)

    @pl.when(l == last)
    def _finalize():
        tb = sum_acc.shape[0]
        # Deferred cross-lane (XLU) reduces: once per B-tile, not per chunk.
        avg = jnp.sum(sum_acc[...], axis=-1) * (1.0 / l_total)     # (tb, C)
        mx = jnp.max(max_acc[...], axis=-1)                        # (tb, C)

        # Merge both shared-MLP branches into one pair of MXU dots.
        pooled = jnp.concatenate([avg, mx], axis=0)                # (2*tb, C)
        w1 = w1_ref[...].astype(jnp.float32)
        b1 = b1_ref[...].astype(jnp.float32)
        w2 = w2_ref[...].astype(jnp.float32)
        b2 = b2_ref[...].astype(jnp.float32)

        h = jnp.dot(pooled, w1, preferred_element_type=jnp.float32) + b1
        h = jnp.maximum(h, 0.0)                                    # ReLU
        y = jnp.dot(h, w2, preferred_element_type=jnp.float32) + b2

        out = jax.nn.sigmoid(y[:tb] + y[tb:])                      # (tb, C)
        o_ref[...] = out.astype(o_ref.dtype)


def _round_up(v, m):
    return -(-v // m) * m


def channel_attention(x, w1, b1, w2, b2, *, tb=None, tl=None):
    """x: (B, C, L). Returns (B, C, 1), matching the torch forward output."""
    B, C, L = x.shape
    H = w1.shape[1]
    itemsize = x.dtype.itemsize

    # Batch tile: full B for small batches (block == full dim satisfies the
    # (8,128) rule), else sublane-aligned 8-row tiles so grid[0] >= 2 when
    # B >= 16 (both TensorCores active on v7x megacore).
    if tb is None:
        tb = B if B <= 8 else 8

    # L chunk: budget-driven (~6 MiB of x per pipeline buffer); prefer the
    # whole row (rounded up to 128 lanes) whenever it fits the budget.
    if tl is None:
        if L <= 128:
            tl = L
        else:
            per_buf_budget = 6 * 1024 * 1024
            tl_cap = max(512, (per_buf_budget // (tb * C * itemsize)) // 128 * 128)
            tl = min(_round_up(L, 128), tl_cap)
    need_mask = (L % tl) != 0
    lane_w = min(tl, 128)

    n_b = pl.cdiv(B, tb)
    n_l = pl.cdiv(L, tl)
    grid = (n_b, n_l)

    kernel = functools.partial(
        _channel_attention_kernel,
        l_total=L, tl=tl, lane_w=lane_w, need_mask=need_mask)

    # Triple-buffer the streamed x input when there are enough L steps to
    # hide DMA issue latency; default double-buffering otherwise.
    n_buf = 3 if n_l >= 3 else 2
    if n_buf == 3:
        x_spec = pl.BlockSpec((tb, C, tl), lambda b, l: (b, 0, l),
                              pipeline_mode=pl.Buffered(3))
    else:
        x_spec = pl.BlockSpec((tb, C, tl), lambda b, l: (b, 0, l))

    # VMEM budget: x buffers + f32 accumulators/temporaries + weights,
    # capped below the physical VMEM per TensorCore (64 MiB on v7x).
    x_tile_bytes = tb * C * tl * itemsize
    acc_bytes = tb * C * lane_w * 4
    try:
        phys_vmem = pltpu.get_tpu_info().vmem_capacity_bytes
    except Exception:
        phys_vmem = 64 * 1024 * 1024      # conservative: v7x per-TC VMEM
    hard_cap = min((int(phys_vmem) * 3) // 4, 96 * 1024 * 1024)
    needed = n_buf * x_tile_bytes + 6 * acc_bytes + (2 << 20)
    vmem_limit = int(min(hard_cap, max(32 * 1024 * 1024, needed)))

    out2d = pl.pallas_call(
        kernel,
        out_shape=jax.ShapeDtypeStruct((B, C), x.dtype),
        grid_spec=pltpu.PrefetchScalarGridSpec(
            num_scalar_prefetch=0,
            grid=grid,
            in_specs=[
                x_spec,
                pl.BlockSpec((C, H), lambda b, l: (0, 0)),
                pl.BlockSpec((1, H), lambda b, l: (0, 0)),
                pl.BlockSpec((H, C), lambda b, l: (0, 0)),
                pl.BlockSpec((1, C), lambda b, l: (0, 0)),
            ],
            out_specs=pl.BlockSpec((tb, C), lambda b, l: (b, 0)),
            scratch_shapes=[
                pltpu.VMEM((tb, C, lane_w), jnp.float32),   # lane-resident sum
                pltpu.VMEM((tb, C, lane_w), jnp.float32),   # lane-resident max
            ],
        ),
        compiler_params=pltpu.CompilerParams(
            dimension_semantics=("parallel", "arbitrary"),
            vmem_limit_bytes=vmem_limit,
        ),
        cost_estimate=pl.CostEstimate(
            flops=8 * B * C * H + 3 * B * C * L,
            transcendentals=B * C,
            bytes_accessed=x.size * itemsize + B * C * itemsize,
        ),
    )(x, w1, b1, w2, b2)

    return out2d[..., None]  # (B, C, 1)


def reference(x, w1, b1, w2, b2):
    xf = x.astype(jnp.float32)
    avg = jnp.mean(xf, axis=-1)
    mx = jnp.max(xf, axis=-1)

    def mlp(v):
        h = jnp.maximum(v @ w1 + b1, 0.0)
        return h @ w2 + b2

    return jax.nn.sigmoid(mlp(avg) + mlp(mx))[..., None].astype(x.dtype)


if __name__ == "__main__":
    # channels must be divisible by ratio=16 -> C=64, hidden H=4.
    B, C = 4, 64
    ratio = 16
    H = C // ratio

    key = jax.random.PRNGKey(0)
    kx, k1, k2, k3, k4, kx2, kx3 = jax.random.split(key, 7)

    # Deterministic parameter init (PyTorch Linear-like uniform bounds).
    bound1 = 1.0 / (C ** 0.5)
    bound2 = 1.0 / (H ** 0.5)
    # Stored pre-transposed: w1 is (C, H) = torch weight (H, C).T, w2 is (H, C).
    w1 = jax.random.uniform(k1, (C, H), jnp.float32, -bound1, bound1)
    b1 = jax.random.uniform(k2, (1, H), jnp.float32, -bound1, bound1)
    w2 = jax.random.uniform(k3, (H, C), jnp.float32, -bound2, bound2)
    b2 = jax.random.uniform(k4, (1, C), jnp.float32, -bound2, bound2)

    # Test 1: default heuristics -> full-row L block (tl == 256), single step.
    x1 = jax.random.normal(kx, (B, C, 256), dtype=jnp.float32)
    out1 = channel_attention(x1, w1, b1, w2, b2)
    jax.block_until_ready(out1)
    ref1 = reference(x1, w1, b1, w2, b2)
    assert out1.shape == (B, C, 1), out1.shape
    assert jnp.allclose(out1, ref1, atol=1e-5, rtol=1e-5), "mismatch (test 1)"

    # Test 2: ragged L (200 % 128 != 0) with explicit tl=128 -> exercises the
    # streamed path plus the gated tail-masking branch.
    x2 = jax.random.normal(kx2, (B, C, 200), dtype=jnp.float32)
    out2 = channel_attention(x2, w1, b1, w2, b2, tl=128)
    jax.block_until_ready(out2)
    ref2 = reference(x2, w1, b1, w2, b2)
    assert jnp.allclose(out2, ref2, atol=1e-5, rtol=1e-5), "mismatch (test 2)"

    # Test 3: many L steps (640 / 128 = 5) -> exercises the triple-buffered
    # (pl.Buffered(3)) streaming path.
    x3 = jax.random.normal(kx3, (B, C, 640), dtype=jnp.float32)
    out3 = channel_attention(x3, w1, b1, w2, b2, tl=128)
    jax.block_until_ready(out3)
    ref3 = reference(x3, w1, b1, w2, b2)
    assert jnp.allclose(out3, ref3, atol=1e-5, rtol=1e-5), "mismatch (test 3)"

    print("KERNEL_OK")
</pallas_src>

<mosaic_0001>
module attributes {stable_mosaic.version = 11 : i64} {
  func.func @_channel_attention_kernel(%arg0: i32, %arg1: i32, %arg2: memref<4x64x256xf32, #tpu.memory_space<vmem>>, %arg3: memref<64x4xf32, #tpu.memory_space<vmem>>, %arg4: memref<1x4xf32, #tpu.memory_space<vmem>>, %arg5: memref<4x64xf32, #tpu.memory_space<vmem>>, %arg6: memref<1x64xf32, #tpu.memory_space<vmem>>, %arg7: memref<4x64xf32, #tpu.memory_space<vmem>>, %arg8: memref<4x64x128xf32, #tpu.memory_space<vmem>>, %arg9: memref<4x64x128xf32, #tpu.memory_space<vmem>>) attributes {dimension_semantics = [#tpu.dimension_semantics<parallel>, #tpu.dimension_semantics<arbitrary>], iteration_bounds = array<i64: 1, 1>, scalar_prefetch = 0 : i64, scratch_operands = 2 : i64, tpu.core_type = #tpu.core_type<tc>, window_params = [{transform_indices = @transform_0, window_bounds = array<i64: 4, 64, 256>}, {pipeline_mode = #tpu.pipeline_mode<synchronous>, transform_indices = @transform_1, window_bounds = array<i64: 64, 4>}, {pipeline_mode = #tpu.pipeline_mode<synchronous>, transform_indices = @transform_2, window_bounds = array<i64: 1, 4>}, {pipeline_mode = #tpu.pipeline_mode<synchronous>, transform_indices = @transform_3, window_bounds = array<i64: 4, 64>}, {pipeline_mode = #tpu.pipeline_mode<synchronous>, transform_indices = @transform_4, window_bounds = array<i64: 1, 64>}, {transform_indices = @transform_5, window_bounds = array<i64: 4, 64>}]} {
    %c0_i32 = arith.constant 0 : i32
    %0 = arith.cmpi eq, %arg1, %c0_i32 : i32
    %1 = arith.extui %0 : i1 to i32
    %c0_i32_0 = arith.constant 0 : i32
    %2 = arith.cmpi ne, %1, %c0_i32_0 : i32
    scf.if %2 {
      %cst = arith.constant 0.000000e+00 : f32
      %20 = vector.broadcast %cst : f32 to vector<4x64x128xf32>
      %c0_31 = arith.constant 0 : index
      %c0_32 = arith.constant 0 : index
      %c0_33 = arith.constant 0 : index
      %21 = vector.load %arg8[%c0_31, %c0_32, %c0_33] : memref<4x64x128xf32, #tpu.memory_space<vmem>>, vector<4x64x128xf32>
      tpu.vector_store %arg8[%c0_31, %c0_32, %c0_33], %20 {strides = array<i32>} : memref<4x64x128xf32, #tpu.memory_space<vmem>>, vector<4x64x128xf32>,
      %cst_34 = arith.constant 0xFF800000 : f32
      %22 = vector.broadcast %cst_34 : f32 to vector<4x64x128xf32>
      %c0_35 = arith.constant 0 : index
      %c0_36 = arith.constant 0 : index
      %c0_37 = arith.constant 0 : index
      %23 = vector.load %arg9[%c0_35, %c0_36, %c0_37] : memref<4x64x128xf32, #tpu.memory_space<vmem>>, vector<4x64x128xf32>
      tpu.vector_store %arg9[%c0_35, %c0_36, %c0_37], %22 {strides = array<i32>} : memref<4x64x128xf32, #tpu.memory_space<vmem>>, vector<4x64x128xf32>,
    } else {
    }
    %c0 = arith.constant 0 : index
    %c0_1 = arith.constant 0 : index
    %c0_2 = arith.constant 0 : index
    %3 = vector.load %arg2[%c0, %c0_1, %c0_2] : memref<4x64x256xf32, #tpu.memory_space<vmem>>, vector<4x64x128xf32>
    %c0_3 = arith.constant 0 : index
    %c0_4 = arith.constant 0 : index
    %c0_5 = arith.constant 0 : index
    %4 = vector.load %arg8[%c0_3, %c0_4, %c0_5] : memref<4x64x128xf32, #tpu.memory_space<vmem>>, vector<4x64x128xf32>
    %5 = arith.addf %4, %3 : vector<4x64x128xf32>
    %c0_6 = arith.constant 0 : index
    %c0_7 = arith.constant 0 : index
    %c0_8 = arith.constant 0 : index
    %6 = vector.load %arg8[%c0_6, %c0_7, %c0_8] : memref<4x64x128xf32, #tpu.memory_space<vmem>>, vector<4x64x128xf32>
    tpu.vector_store %arg8[%c0_6, %c0_7, %c0_8], %5 {strides = array<i32>} : memref<4x64x128xf32, #tpu.memory_space<vmem>>, vector<4x64x128xf32>,
    %c0_9 = arith.constant 0 : index
    %c0_10 = arith.constant 0 : index
    %c0_11 = arith.constant 0 : index
    %7 = vector.load %arg9[%c0_9, %c0_10, %c0_11] : memref<4x64x128xf32, #tpu.memory_space<vmem>>, vector<4x64x128xf32>
    %8 = arith.maximumf %7, %3 : vector<4x64x128xf32>
    %c0_12 = arith.constant 0 : index
    %c0_13 = arith.constant 0 : index
    %c0_14 = arith.constant 0 : index
    %9 = vector.load %arg9[%c0_12, %c0_13, %c0_14] : memref<4x64x128xf32, #tpu.memory_space<vmem>>, vector<4x64x128xf32>
    tpu.vector_store %arg9[%c0_12, %c0_13, %c0_14], %8 {strides = array<i32>} : memref<4x64x128xf32, #tpu.memory_space<vmem>>, vector<4x64x128xf32>,
    %c0_15 = arith.constant 0 : index
    %c0_16 = arith.constant 0 : index
    %c128 = arith.constant 128 : index
    %10 = vector.load %arg2[%c0_15, %c0_16, %c128] : memref<4x64x256xf32, #tpu.memory_space<vmem>>, vector<4x64x128xf32>
    %c0_17 = arith.constant 0 : index
    %c0_18 = arith.constant 0 : index
    %c0_19 = arith.constant 0 : index
    %11 = vector.load %arg8[%c0_17, %c0_18, %c0_19] : memref<4x64x128xf32, #tpu.memory_space<vmem>>, vector<4x64x128xf32>
    %12 = arith.addf %11, %10 : vector<4x64x128xf32>
    %c0_20 = arith.constant 0 : index
    %c0_21 = arith.constant 0 : index
    %c0_22 = arith.constant 0 : index
    %13 = vector.load %arg8[%c0_20, %c0_21, %c0_22] : memref<4x64x128xf32, #tpu.memory_space<vmem>>, vector<4x64x128xf32>
    tpu.vector_store %arg8[%c0_20, %c0_21, %c0_22], %12 {strides = array<i32>} : memref<4x64x128xf32, #tpu.memory_space<vmem>>, vector<4x64x128xf32>,
    %c0_23 = arith.constant 0 : index
    %c0_24 = arith.constant 0 : index
    %c0_25 = arith.constant 0 : index
    %14 = vector.load %arg9[%c0_23, %c0_24, %c0_25] : memref<4x64x128xf32, #tpu.memory_space<vmem>>, vector<4x64x128xf32>
    %15 = arith.maximumf %14, %10 : vector<4x64x128xf32>
    %c0_26 = arith.constant 0 : index
    %c0_27 = arith.constant 0 : index
    %c0_28 = arith.constant 0 : index
    %16 = vector.load %arg9[%c0_26, %c0_27, %c0_28] : memref<4x64x128xf32, #tpu.memory_space<vmem>>, vector<4x64x128xf32>
    tpu.vector_store %arg9[%c0_26, %c0_27, %c0_28], %15 {strides = array<i32>} : memref<4x64x128xf32, #tpu.memory_space<vmem>>, vector<4x64x128xf32>,
    %c0_i32_29 = arith.constant 0 : i32
    %17 = arith.cmpi eq, %arg1, %c0_i32_29 : i32
    %18 = arith.extui %17 : i1 to i32
    %c0_i32_30 = arith.constant 0 : i32
    %19 = arith.cmpi ne, %18, %c0_i32_30 : i32
    scf.if %19 {
      %c0_31 = arith.constant 0 : index
      %c0_32 = arith.constant 0 : index
      %c0_33 = arith.constant 0 : index
      %20 = vector.load %arg8[%c0_31, %c0_32, %c0_33] : memref<4x64x128xf32, #tpu.memory_space<vmem>>, vector<4x64x128xf32>
      %cst = arith.constant dense<0.000000e+00> : vector<4x64xf32>
      %21 = vector.multi_reduction <add>, %20, %cst [2] : vector<4x64x128xf32> to vector<4x64xf32>
      %cst_34 = arith.constant 3.906250e-03 : f32
      %22 = vector.broadcast %cst_34 : f32 to vector<4x64xf32>
      %23 = arith.mulf %21, %22 : vector<4x64xf32>
      %c0_35 = arith.constant 0 : index
      %c0_36 = arith.constant 0 : index
      %c0_37 = arith.constant 0 : index
      %24 = vector.load %arg9[%c0_35, %c0_36, %c0_37] : memref<4x64x128xf32, #tpu.memory_space<vmem>>, vector<4x64x128xf32>
      %cst_38 = arith.constant dense<0xFF800000> : vector<4x64xf32>
      %25 = vector.multi_reduction <maximumf>, %24, %cst_38 [2] : vector<4x64x128xf32> to vector<4x64xf32>
      %26 = tpu.concatenate %23, %25 in 0 : vector<4x64xf32>, vector<4x64xf32> -> vector<8x64xf32>
      %c0_39 = arith.constant 0 : index
      %c0_40 = arith.constant 0 : index
      %27 = vector.load %arg3[%c0_39, %c0_40] : memref<64x4xf32, #tpu.memory_space<vmem>>, vector<64x4xf32>
      %c0_41 = arith.constant 0 : index
      %c0_42 = arith.constant 0 : index
      %28 = vector.load %arg4[%c0_41, %c0_42] : memref<1x4xf32, #tpu.memory_space<vmem>>, vector<1x4xf32>
      %c0_43 = arith.constant 0 : index
      %c0_44 = arith.constant 0 : index
      %29 = vector.load %arg5[%c0_43, %c0_44] : memref<4x64xf32, #tpu.memory_space<vmem>>, vector<4x64xf32>
      %c0_45 = arith.constant 0 : index
      %c0_46 = arith.constant 0 : index
      %30 = vector.load %arg6[%c0_45, %c0_46] : memref<1x64xf32, #tpu.memory_space<vmem>>, vector<1x64xf32>
      %cst_47 = arith.constant dense<0.000000e+00> : vector<8x4xf32>
      %31 = tpu.matmul %26, %27, %cst_47 {dimension_numbers = #tpu.dot_dimension_numbers<[1], [0], [0], [1], [0, 0, 1, 1], [], []>} : vector<8x64xf32>, vector<64x4xf32>, vector<8x4xf32> -> vector<8x4xf32>
      %32 = vector.broadcast %28 : vector<1x4xf32> to vector<8x4xf32>
      %33 = arith.addf %31, %32 : vector<8x4xf32>
      %cst_48 = arith.constant 0.000000e+00 : f32
      %34 = vector.broadcast %cst_48 : f32 to vector<8x4xf32>
      %35 = arith.maximumf %33, %34 : vector<8x4xf32>
      %cst_49 = arith.constant dense<0.000000e+00> : vector<8x64xf32>
      %36 = tpu.matmul %35, %29, %cst_49 {dimension_numbers = #tpu.dot_dimension_numbers<[1], [0], [0], [1], [0, 0, 1, 1], [], []>} : vector<8x4xf32>, vector<4x64xf32>, vector<8x64xf32> -> vector<8x64xf32>
      %37 = vector.broadcast %30 : vector<1x64xf32> to vector<8x64xf32>
      %38 = arith.addf %36, %37 : vector<8x64xf32>
      %39 = vector.extract_strided_slice %38 {offsets = [0, 0], sizes = [4, 64], strides = [1, 1]} : vector<8x64xf32> to vector<4x64xf32>
      %40 = vector.extract_strided_slice %38 {offsets = [4, 0], sizes = [4, 64], strides = [1, 1]} : vector<8x64xf32> to vector<4x64xf32>
      %41 = arith.addf %39, %40 : vector<4x64xf32>
      %42 = arith.negf %41 : vector<4x64xf32>
      %43 = math.exp %42 : vector<4x64xf32>
      %cst_50 = arith.constant 1.000000e+00 : f32
      %44 = vector.broadcast %cst_50 : f32 to vector<4x64xf32>
      %45 = arith.addf %44, %43 : vector<4x64xf32>
      %46 = arith.divf %44, %45 : vector<4x64xf32>
      %c0_51 = arith.constant 0 : index
      %c0_52 = arith.constant 0 : index
      %47 = vector.load %arg7[%c0_51, %c0_52] : memref<4x64xf32, #tpu.memory_space<vmem>>, vector<4x64xf32>
      tpu.vector_store %arg7[%c0_51, %c0_52], %46 {strides = array<i32>} : memref<4x64xf32, #tpu.memory_space<vmem>>, vector<4x64xf32>,
    } else {
    }
    return
  }
  func.func @transform_0(%arg0: i32, %arg1: i32) -> (i32, i32, i32) {
    %c0_i32 = arith.constant 0 : i32
    %c0_i32_0 = arith.constant 0 : i32
    return %arg0, %c0_i32, %arg1 : i32, i32, i32
  }
  func.func @transform_1(%arg0: i32, %arg1: i32) -> (i32, i32) {
    %c0_i32 = arith.constant 0 : i32
    %c0_i32_0 = arith.constant 0 : i32
    %c0_i32_1 = arith.constant 0 : i32
    return %c0_i32, %c0_i32_0 : i32, i32
  }
  func.func @transform_2(%arg0: i32, %arg1: i32) -> (i32, i32) {
    %c0_i32 = arith.constant 0 : i32
    %c0_i32_0 = arith.constant 0 : i32
    %c0_i32_1 = arith.constant 0 : i32
    return %c0_i32, %c0_i32_0 : i32, i32
  }
  func.func @transform_3(%arg0: i32, %arg1: i32) -> (i32, i32) {
    %c0_i32 = arith.constant 0 : i32
    %c0_i32_0 = arith.constant 0 : i32
    %c0_i32_1 = arith.constant 0 : i32
    return %c0_i32, %c0_i32_0 : i32, i32
  }
  func.func @transform_4(%arg0: i32, %arg1: i32) -> (i32, i32) {
    %c0_i32 = arith.constant 0 : i32
    %c0_i32_0 = arith.constant 0 : i32
    %c0_i32_1 = arith.constant 0 : i32
    return %c0_i32, %c0_i32_0 : i32, i32
  }
  func.func @transform_5(%arg0: i32, %arg1: i32) -> (i32, i32) {
    %c0_i32 = arith.constant 0 : i32
    %c0_i32_0 = arith.constant 0 : i32
    return %arg0, %c0_i32 : i32, i32
  }
}

</mosaic_0001>

<bundles_post_ra>
// kernel: tpu_custom_call.1
= control target key start
LH: loop header
LB: loop body
LE: loop exit
PB: predicated region body
PF: predicated region fallthrough
CT: control target
= control target key end

     0   :  { %10 = vsyncpa [#allocation5], 0  ;;  %s1645_s0 = inlined_call_operand.hbm [shape: f32[4,64,256], index: 0, kind: input, shape index: {}]   ;;  %s1646_s1 = inlined_call_operand.vmem [shape: f32[64,4], index: 1, kind: input, shape index: {}]   ;;  %s1647_s2 = inlined_call_operand.vmem [shape: f32[1,4], index: 2, kind: input, shape index: {}]   ;;  %s1648_s3 = inlined_call_operand.vmem [shape: f32[4,64], index: 3, kind: input, shape index: {}]   ;;  %s1649_s4 = inlined_call_operand.vmem [shape: f32[1,64], index: 4, kind: input, shape index: {}]   ;;  %s1650_s5 = inlined_call_operand.hbm [shape: f32[4,64], index: 5, kind: output, shape index: {}]  }
   0x1   :  { %11 = vsyncpa [#allocation6], 0  ;;  %s16_s20 = sshll.u32 %s1645_s0, 4  ;;  %s1173_s21 = smov [#allocation4]   ;;  %s17_s20 = int_to_ptr.hbm [resolvable:$true] %s16_s20 }
   0x2   :  { %s18_s22 = sshll.u32 %s1173_s21, 4  ;;  %s1174_s23 = smov 256   ;;  %s19_s22 = int_to_ptr.vmem [resolvable:$true] %s18_s22 }
   0x3   :  { %s1175_s24 = smov 16  }
   0x4   :  { %24 = dma.hbm_to_vmem [thread:$0]  %s17_s20, 8192, %s19_s22, [#allocation5], %s1174_s23, %s1174_s23, %s1175_s24  }
   0x5   :  { %1169 = dma.done.wait [#allocation5], 8192  }
   0x6   :  { %1170 = vsyncadd [#allocation5], 4294959104  ;;  %v1210_v0 = vld [vmem:[#allocation4 + $0x80] sm:$0xff]  ;;  %v337_v1 = vld [vmem:[#allocation4 + $0x88] sm:$0xff]  ;;  %vm817_vm0 = vcmask 130112   ;;  %vm821_vm1 = vcmask 195712  }
   0x7   :  { %v1212_v2 = vld [vmem:[#allocation4 + $0x20] sm:$0xff]  ;;  %v401_v3 = vadd.f32 %v337_v1, %v1210_v0  ;;  %v1215_v4 = vld [vmem:[#allocation4 + $0x28] sm:$0xff]  ;;  %v114_v9 = vld [vmem:[#allocation4 + $0x90] sm:$0xff]  ;;  %v497_v45 = vmax.f32 %v1210_v0, %v337_v1  ;;  %vm825_vm2 = vcmask 261312   ;;  %vm829_vm3 = vcmask 326912   ;;  %s1097_s21 = sshll.u32 %s1650_s5, 4  ;;  %s1098_s21 = int_to_ptr.hbm [resolvable:$true] %s1097_s21 }
   0x8   :  { %v105_v5 = vld [vmem:[#allocation4] sm:$0xff]  ;;  %v329_v6 = vld [vmem:[#allocation4 + $0x8] sm:$0xff]  ;;  %v395_v7 = vadd.f32 %v1215_v4, %v1212_v2  ;;  %v338_v10 = vld [vmem:[#allocation4 + $0x98] sm:$0xff]  ;;  %v491_v57 = vmax.f32 %v1212_v2, %v1215_v4  ;;  %vm833_vm4 = vcmask 392512   ;;  %vm837_vm5 = vcmask 458112  }
   0x9   :  { %v393_v8 = vadd.f32 %v329_v6, %v105_v5  ;;  %604 = vadd.xlane.f32.xlu1 %v401_v3  ;;  %v1219_v11 = vld [vmem:[#allocation4 + $0xa0] sm:$0xff]  ;;  %v1221_v12 = vld [vmem:[#allocation4 + $0xa8] sm:$0xff]  ;;  %v106_v13 = vld [vmem:[#allocation4 + $0x10] sm:$0xff]  ;;  %v402_v15 = vadd.f32 %v338_v10, %v114_v9  ;;  %v489_v38 = vmax.f32 %v105_v5, %v329_v6  ;;  %v498_v43 = vmax.f32 %v114_v9, %v338_v10 }
   0xa   :  { %592 = vadd.xlane.f32.xlu2 %v395_v7  ;;  %v330_v14 = vld [vmem:[#allocation4 + $0x18] sm:$0xff]  ;;  %v403_v16 = vadd.f32 %v1221_v12, %v1219_v11  ;;  %v1225_v18 = vld [vmem:[#allocation4 + $0x110] sm:$0xff]  ;;  %v121_v22 = vld [vmem:[#allocation4 + $0x100] sm:$0xff]  ;;  %v499_v55 = vmax.f32 %v1219_v11, %v1221_v12  ;;  %vm841_vm6 = vcmask 523712   ;;  %vm888_vm7 = vcmask 1041409  }
   0xb   :  { %588 = vadd.xlane.f32.xlu0 %v393_v8  ;;  %v394_v17 = vadd.f32 %v330_v14, %v106_v13  ;;  %v1227_v19 = vld [vmem:[#allocation4 + $0x118] sm:$0xff]  ;;  %v1229_v20 = vld [vmem:[#allocation4 + $0x30] sm:$0xff]  ;;  %v345_v23 = vld [vmem:[#allocation4 + $0x108] sm:$0xff]  ;;  %v490_v39 = vmax.f32 %v106_v13, %v330_v14  ;;  %vm890_vm8 = vcmask 1042434   ;;  %vm892_vm9 = vcmask 1043459  }
   0xc   :  { %v1231_v21 = vld [vmem:[#allocation4 + $0x38] sm:$0xff]  ;;  %v410_v24 = vadd.f32 %v1227_v19, %v1225_v18  ;;  %v409_v26 = vadd.f32 %v345_v23, %v121_v22  ;;  %v1237_v27 = vld [vmem:[#allocation4 + $0x120] sm:$0xff]  ;;  %v1239_v28 = vld [vmem:[#allocation4 + $0x128] sm:$0xff]  ;;  %v505_v56 = vmax.f32 %v121_v22, %v345_v23  ;;  %v506_v0 = vmax.f32 %v1225_v18, %v1227_v19 }
   0xd   :  { %v396_v25 = vadd.f32 %v1231_v21, %v1229_v20  ;;  %v1241_v29 = vld [vmem:[#allocation4 + $0x180] sm:$0xff]  ;;  %v1243_v30 = vld [vmem:[#allocation4 + $0x188] sm:$0xff]  ;;  %v1245_v31 = vld [vmem:[#allocation4 + $0xb0] sm:$0xff]  ;;  %v411_v33 = vadd.f32 %v1239_v28, %v1237_v27  ;;  %v492_v6 = vmax.f32 %v1229_v20, %v1231_v21  ;;  %v507_v8 = vmax.f32 %v1237_v27, %v1239_v28 }
   0xe   :  { %v1247_v32 = vld [vmem:[#allocation4 + $0xb8] sm:$0xff]  ;;  %v417_v34 = vadd.f32 %v1243_v30, %v1241_v29  ;;  %v1255_v36 = vld [vmem:[#allocation4 + $0x190] sm:$0xff]  ;;  %v1261_v41 = vld [vmem:[#allocation4 + $0x40] sm:$0xff]  ;;  %v513_v9 = vmax.f32 %v1241_v29, %v1243_v30  ;;  %vm987_vm10 = vcmask 1045509   ;;  %vm989_vm11 = vcmask 1046534  }
   0xf   :  { %v404_v35 = vadd.f32 %v1247_v32, %v1245_v31  ;;  %v1257_v37 = vld [vmem:[#allocation4 + $0x198] sm:$0xff]  ;;  %v1263_v42 = vld [vmem:[#allocation4 + $0x48] sm:$0xff]  ;;  %v1268_v46 = vld [vmem:[#allocation4 + $0x1a0] sm:$0xff]  ;;  %v500_v10 = vmax.f32 %v1245_v31, %v1247_v32  ;;  %vm991_vm12 = vcmask 1047559   ;;  %vm994_vm13 = vcmask 1043456  }
  0x10   :  { %v418_v40 = vadd.f32 %v1257_v37, %v1255_v36  ;;  %v397_v44 = vadd.f32 %v1263_v42, %v1261_v41  ;;  %v1270_v47 = vld [vmem:[#allocation4 + $0x130] sm:$0xff]  ;;  %v1272_v48 = vld [vmem:[#allocation4 + $0x138] sm:$0xff]  ;;  %v1274_v49 = vld [vmem:[#allocation4 + $0x1a8] sm:$0xff]  ;;  %v493_v23 = vmax.f32 %v1261_v41, %v1263_v42  ;;  %vm1010_vm14 = vcmask 523264  }
  0x11   :  { %606 = vadd.xlane.f32.xlu1 %v402_v15  ;;  %v1276_v50 = vld [vmem:[#allocation4 + $0xc0] sm:$0xff]  ;;  %v1278_v51 = vld [vmem:[#allocation4 + $0xc8] sm:$0xff]  ;;  %v412_v52 = vadd.f32 %v1272_v48, %v1270_v47  ;;  %v419_v53 = vadd.f32 %v1274_v49, %v1268_v46  ;;  %v1290_v58 = vld [vmem:[#allocation4 + $0x50] sm:$0xff]  ;;  %vm1038_vm15 = vcmask 31744  }
  0x12   :  { %608 = vadd.xlane.f32.xlu2 %v403_v16  ;;  %v405_v54 = vadd.f32 %v1278_v51, %v1276_v50  ;;  %v1292_v59 = vld [vmem:[#allocation4 + $0x58] sm:$0xff]  ;;  %v1294_v60 = vld [vmem:[#allocation4 + $0xd0] sm:$0xff]  ;;  %v1308_v3 = vld [vmem:[#allocation4 + $0x140] sm:$0xff]  ;;  %v501_v27 = vmax.f32 %v1276_v50, %v1278_v51 }
  0x13   :  { %590 = vadd.xlane.f32.xlu0 %v394_v17  ;;  %v1296_v61 = vld [vmem:[#allocation4 + $0xd8] sm:$0xff]  ;;  %v398_v62 = vadd.f32 %v1292_v59, %v1290_v58  ;;  %v1304_v1 = vld [vmem:[#allocation4 + $0x1b0] sm:$0xff]  ;;  %v1310_v4 = vld [vmem:[#allocation4 + $0x148] sm:$0xff]  ;;  %v514_v17 = vmax.f32 %v1255_v36, %v1257_v37 }
  0x14   :  { %v406_v63 = vadd.f32 %v1296_v61, %v1294_v60  ;;  %v1306_v2 = vld [vmem:[#allocation4 + $0x1b8] sm:$0xff]  ;;  %v413_v7 = vadd.f32 %v1310_v4, %v1308_v3  ;;  %v1324_v11 = vld [vmem:[#allocation4 + $0x60] sm:$0xff]  ;;  %v1326_v12 = vld [vmem:[#allocation4 + $0x68] sm:$0xff] }
  0x15   :  { %v420_v5 = vadd.f32 %v1306_v2, %v1304_v1  ;;  %v1328_v13 = vld [vmem:[#allocation4 + $0xe0] sm:$0xff]  ;;  %v1330_v14 = vld [vmem:[#allocation4 + $0xe8] sm:$0xff]  ;;  %v399_v15 = vadd.f32 %v1326_v12, %v1324_v11  ;;  %v1342_v20 = vld [vmem:[#allocation4 + $0x150] sm:$0xff] }
  0x16   :  { %v407_v16 = vadd.f32 %v1330_v14, %v1328_v13  ;;  %v1338_v18 = vld [vmem:[#allocation4 + $0x1c0] sm:$0xff]  ;;  %v1340_v19 = vld [vmem:[#allocation4 + $0x1c8] sm:$0xff]  ;;  %v1344_v21 = vld [vmem:[#allocation4 + $0x158] sm:$0xff] }
  0x17   :  { %v421_v22 = vadd.f32 %v1340_v19, %v1338_v18  ;;  %v1358_v28 = vld [vmem:[#allocation4 + $0x160] sm:$0xff]  ;;  %v1360_v29 = vld [vmem:[#allocation4 + $0xf0] sm:$0xff]  ;;  %v1362_v30 = vld [vmem:[#allocation4 + $0xf8] sm:$0xff] }
  0x18   :  { %v1364_v31 = vld [vmem:[#allocation4 + $0x168] sm:$0xff]  ;;  %v1366_v32 = vld [vmem:[#allocation4 + $0x70] sm:$0xff]  ;;  %v1393_v50 = vld [vmem:[#allocation4 + $0x178] sm:$0xff] }
  0x19   :  { %622 = vadd.xlane.f32.xlu1 %v410_v24  ;;  %v414_v24 = vadd.f32 %v1344_v21, %v1342_v20  ;;  %v1376_v37 = vld [vmem:[#allocation4 + $0x1d0] sm:$0xff] }
  0x1a   :  { %594 = vadd.xlane.f32.xlu2 %v396_v25  ;;  %v508_v25 = vmax.f32 %v1270_v47, %v1272_v48 }
  0x1b   :  { %620 = vadd.xlane.f32.xlu0 %v409_v26  ;;  %v515_v26 = vmax.f32 %v1268_v46, %v1274_v49  ;;  %v1391_v49 = vld [vmem:[#allocation4 + $0x170] sm:$0xff] }
  0x21   :  { %624 = vadd.xlane.f32.xlu1 %v411_v33  ;;  %v1368_v33 = vld [vmem:[#allocation4 + $0x78] sm:$0xff] }
  0x22   :  { %636 = vadd.xlane.f32.xlu2 %v417_v34  ;;  %v408_v34 = vadd.f32 %v1362_v30, %v1360_v29  ;;  %v400_v36 = vadd.f32 %v1368_v33, %v1366_v32 }
  0x23   :  { %610 = vadd.xlane.f32.xlu0 %v404_v35  ;;  %v415_v35 = vadd.f32 %v1364_v31, %v1358_v28 }
  0x29   :  { %716 = vmax.xlane.f32.xlu1 %v489_v38  ;;  %v1378_v38 = vld [vmem:[#allocation4 + $0x1d8] sm:$0xff] }
  0x2a   :  { %718 = vmax.xlane.f32.xlu2 %v490_v39 }
  0x2b   :  { %638 = vadd.xlane.f32.xlu0 %v418_v40  ;;  %v812_v40 = vlaneseq }
  0x2d   :  { %v1386_v46 = vand.u32 127, %v812_v40 }
  0x2f   :  { %v1389_v48 = vadd.s32 4294967288, %v1386_v46  ;;  %v1396_v51 = vadd.s32 4294967280, %v1386_v46 }
  0x31   :  { %734 = vmax.xlane.f32.xlu1 %v498_v43  ;;  %v494_v43 = vmax.f32 %v1290_v58, %v1292_v59  ;;  %v516_v59 = vmax.f32 %v1304_v1, %v1306_v2 }
  0x32   :  { %596 = vadd.xlane.f32.xlu2 %v397_v44  ;;  %v502_v44 = vmax.f32 %v1294_v60, %v1296_v61 }
  0x33   :  { %732 = vmax.xlane.f32.xlu0 %v497_v45  ;;  %v422_v45 = vadd.f32 %v1378_v38, %v1376_v37 }
  0x39   :  { %626 = vadd.xlane.f32.xlu1 %v412_v52 }
  0x3a   :  { %640 = vadd.xlane.f32.xlu2 %v419_v53 }
  0x3b   :  { %612 = vadd.xlane.f32.xlu0 %v405_v54 }
  0x41   :  { %736 = vmax.xlane.f32.xlu1 %v499_v55 }
  0x42   :  { %748 = vmax.xlane.f32.xlu2 %v505_v56 }
  0x43   :  { %720 = vmax.xlane.f32.xlu0 %v491_v57 }
  0x49   :  { %598 = vadd.xlane.f32.xlu1 %v398_v62  ;;  %v416_v62 = vadd.f32 %v1393_v50, %v1391_v49 }
  0x4a   :  { %614 = vadd.xlane.f32.xlu2 %v406_v63  ;;  %v509_v63 = vmax.f32 %v1308_v3, %v1310_v4  ;;  %v1414_v4 = vld [vmem:[#allocation4 + $0x1e0] sm:$0xff] }
  0x4b   :  { %750 = vmax.xlane.f32.xlu0 %v506_v0 }
  0x51   :  { %642 = vadd.xlane.f32.xlu1 %v420_v5 }
  0x52   :  { %722 = vmax.xlane.f32.xlu2 %v492_v6 }
  0x53   :  { %628 = vadd.xlane.f32.xlu0 %v413_v7 }
  0x59   :  { %752 = vmax.xlane.f32.xlu1 %v507_v8 }
  0x5a   :  { %764 = vmax.xlane.f32.xlu2 %v513_v9 }
  0x5b   :  { %738 = vmax.xlane.f32.xlu0 %v500_v10  ;;  %v1416_v10 = vld [vmem:[#allocation4 + $0x1e8] sm:$0xff] }
  0x61   :  { %600 = vadd.xlane.f32.xlu1 %v399_v15 }
  0x62   :  { %616 = vadd.xlane.f32.xlu2 %v407_v16  ;;  %v1419_v16 = vadd.s32 4294967272, %v1386_v46 }
  0x63   :  { %766 = vmax.xlane.f32.xlu0 %v514_v17 }
  0x69   :  { %644 = vadd.xlane.f32.xlu1 %v421_v22 }
  0x6a   :  { %724 = vmax.xlane.f32.xlu2 %v493_v23 }
  0x6b   :  { %630 = vadd.xlane.f32.xlu0 %v414_v24  ;;  %v495_v24 = vmax.f32 %v1324_v11, %v1326_v12  ;;  %v1432_v12 = vld [vmem:[#allocation4 + $0x1f0] sm:$0xff] }
  0x71   :  { %754 = vmax.xlane.f32.xlu1 %v508_v25 }
  0x72   :  { %768 = vmax.xlane.f32.xlu2 %v515_v26 }
  0x73   :  { %740 = vmax.xlane.f32.xlu0 %v501_v27  ;;  %v503_v27 = vmax.f32 %v1328_v13, %v1330_v14  ;;  %v1434_v13 = vld [vmem:[#allocation4 + $0x1f8] sm:$0xff] }
  0x79   :  { %618 = vadd.xlane.f32.xlu1 %v408_v34  ;;  %v423_v34 = vadd.f32 %v1416_v10, %v1414_v4 }
  0x7a   :  { %632 = vadd.xlane.f32.xlu2 %v415_v35 }
  0x7b   :  { %602 = vadd.xlane.f32.xlu0 %v400_v36 }
  0x7c   :  { %v605_v39 = vpop.xlane.xlu1 %604 }
  0x7d   :  { %v593_v41 = vpop.xlane.xlu2 %592  ;;  %v660_v47 = vmul.f32 0.00390625, %v605_v39 }
  0x7e   :  { %v589_v42 = vpop.xlane.xlu0 %588  ;;  %v654_v55 = vmul.f32 0.00390625, %v593_v41 }
  0x7f   :  { %v652_v52 = vmul.f32 0.00390625, %v589_v42  ;;  %v843_v54 = vperm.slane %v660_v47, %v1386_v46  ;;  %v424_v47 = vadd.f32 %v1434_v13, %v1432_v12 }
  0x80   :  { %v820_v8 = vperm.slane %v654_v55, %v1396_v51 }
  0x81   :  { %726 = vmax.xlane.f32.xlu1 %v494_v43  ;;  %v814_v5 = vperm.slane %v652_v52, %v1386_v46  ;;  %v510_v52 = vmax.f32 %v1342_v20, %v1344_v21  ;;  %v511_v20 = vmax.f32 %v1358_v28, %v1364_v31  ;;  %v504_v21 = vmax.f32 %v1360_v29, %v1362_v30 }
  0x82   :  { %742 = vmax.xlane.f32.xlu2 %v502_v44  ;;  %v517_v44 = vmax.f32 %v1338_v18, %v1340_v19  ;;  %v1459_v28 = vadd.s32 4294967264, %v1386_v46 }
  0x83   :  { %646 = vadd.xlane.f32.xlu0 %v422_v45 }
  0x84   :  { %v607_v53 = vpop.xlane.xlu1 %606 }
  0x85   :  { %v661_v56 = vmul.f32 0.00390625, %v607_v53  ;;  %v609_v57 = vpop.xlane.xlu2 %608 }
  0x86   :  { %v591_v58 = vpop.xlane.xlu0 %590  ;;  %v662_v60 = vmul.f32 0.00390625, %v609_v57 }
  0x87   :  { %v653_v61 = vmul.f32 0.00390625, %v591_v58  ;;  %v844_v0 = vperm.slane %v661_v56, %v1389_v48 }
  0x88   :  { %v846_v6 = vperm.slane %v662_v60, %v1396_v51 }
  0x89   :  { %v816_v7 = vperm.slane %v653_v61, %v1389_v48  ;;  %v845_v1 = vsel %vm817_vm0, %v844_v0, %v843_v54  ;;  %770 = vmax.xlane.f32.xlu1 %v516_v59 }
  0x8a   :  { %v847_v2 = vsel %vm821_vm1, %v846_v6, %v845_v1  ;;  %634 = vadd.xlane.f32.xlu2 %v416_v62  ;;  %v518_v1 = vmax.f32 %v1376_v37, %v1378_v38  ;;  %v520_v37 = vmax.f32 %v1432_v12, %v1434_v13  ;;  %v1485_v13 = vadd.s32 4294967256, %v1386_v46 }
  0x8b   :  { %v818_v9 = vsel %vm817_vm0, %v816_v7, %v814_v5  ;;  %756 = vmax.xlane.f32.xlu0 %v509_v63  ;;  %v496_v63 = vmax.f32 %v1366_v32, %v1368_v33  ;;  %v512_v32 = vmax.f32 %v1391_v49, %v1393_v50 }
  0x8c   :  { %v822_v3 = vsel %vm821_vm1, %v820_v8, %v818_v9  ;;  %v623_v15 = vpop.xlane.xlu1 %622 }
  0x8d   :  { %v669_v17 = vmul.f32 0.00390625, %v623_v15  ;;  %v595_v22 = vpop.xlane.xlu2 %594 }
  0x8e   :  { %v621_v23 = vpop.xlane.xlu0 %620  ;;  %v655_v25 = vmul.f32 0.00390625, %v595_v22 }
  0x8f   :  { %v668_v26 = vmul.f32 0.00390625, %v621_v23  ;;  %v859_v35 = vperm.slane %v669_v17, %v1389_v48 }
  0x90   :  { %v824_v36 = vperm.slane %v655_v25, %v1419_v16 }
  0x91   :  { %v858_v39 = vperm.slane %v668_v26, %v1386_v46  ;;  %728 = vmax.xlane.f32.xlu1 %v495_v24 }
  0x92   :  { %v826_v40 = vsel %vm825_vm2, %v824_v36, %v822_v3  ;;  %744 = vmax.xlane.f32.xlu2 %v503_v27 }
  0x93   :  { %v860_v11 = vsel %vm817_vm0, %v859_v35, %v858_v39  ;;  %648 = vadd.xlane.f32.xlu0 %v423_v34 }
  0x94   :  { %v625_v14 = vpop.xlane.xlu1 %624 }
  0x95   :  { %v670_v41 = vmul.f32 0.00390625, %v625_v14  ;;  %v637_v42 = vpop.xlane.xlu2 %636 }
  0x96   :  { %v611_v43 = vpop.xlane.xlu0 %610  ;;  %v676_v56 = vmul.f32 0.00390625, %v637_v42 }
  0x97   :  { %v663_v45 = vmul.f32 0.00390625, %v611_v43  ;;  %v861_v53 = vperm.slane %v670_v41, %v1396_v51 }
  0x98   :  { %v873_v60 = vperm.slane %v676_v56, %v1386_v46 }
  0x99   :  { %v848_v54 = vperm.slane %v663_v45, %v1419_v16  ;;  %v862_v55 = vsel %vm821_vm1, %v861_v53, %v860_v11  ;;  %772 = vmax.xlane.f32.xlu1 %v517_v44 }
  0x9a   :  { %650 = vadd.xlane.f32.xlu2 %v424_v47 }
  0x9b   :  { %v849_v57 = vsel %vm825_vm2, %v848_v54, %v847_v2  ;;  %758 = vmax.xlane.f32.xlu0 %v510_v52  ;;  %v519_v2 = vmax.f32 %v1414_v4, %v1416_v10 }
  0x9c   :  { %v717_v18 = vpop.xlane.xlu1 %716 }
  0x9d   :  { %v719_v19 = vpop.xlane.xlu2 %718  ;;  %v927_v58 = vperm.slane %v717_v18, %v1386_v46 }
  0x9e   :  { %v639_v59 = vpop.xlane.xlu0 %638  ;;  %v928_v61 = vperm.slane %v719_v19, %v1389_v48 }
  0x9f   :  { %v677_v62 = vmul.f32 0.00390625, %v639_v59 }
  0xa0   :  { %v929_v0 = vsel %vm817_vm0, %v928_v61, %v927_v58 }
  0xa1   :  { %v874_v5 = vperm.slane %v677_v62, %v1389_v48  ;;  %746 = vmax.xlane.f32.xlu1 %v504_v21 }
  0xa2   :  { %760 = vmax.xlane.f32.xlu2 %v511_v20 }
  0xa3   :  { %v875_v6 = vsel %vm817_vm0, %v874_v5, %v873_v60  ;;  %730 = vmax.xlane.f32.xlu0 %v496_v63 }
  0xa4   :  { %v735_v29 = vpop.xlane.xlu1 %734 }
  0xa5   :  { %v597_v30 = vpop.xlane.xlu2 %596  ;;  %v943_v31 = vperm.slane %v735_v29, %v1389_v48 }
  0xa6   :  { %v733_v7 = vpop.xlane.xlu0 %732  ;;  %v656_v33 = vmul.f32 0.00390625, %v597_v30 }
  0xa7   :  { %v942_v8 = vperm.slane %v733_v7, %v1386_v46 }
  0xa8   :  { %v828_v9 = vperm.slane %v656_v33, %v1459_v28 }
  0xa9   :  { %v944_v3 = vsel %vm817_vm0, %v943_v31, %v942_v8  ;;  %762 = vmax.xlane.f32.xlu1 %v512_v32  ;;  %v1513_v32 = vadd.s32 4294967248, %v1386_v46 }
  0xaa   :  { %v830_v15 = vsel %vm829_vm3, %v828_v9, %v826_v40  ;;  %776 = vmax.xlane.f32.xlu2 %v519_v2 }
  0xab   :  { %774 = vmax.xlane.f32.xlu0 %v518_v1 }
  0xac   :  { %v627_v49 = vpop.xlane.xlu1 %626 }
  0xad   :  { %v641_v50 = vpop.xlane.xlu2 %640  ;;  %v671_v17 = vmul.f32 0.00390625, %v627_v49 }
  0xae   :  { %v613_v22 = vpop.xlane.xlu0 %612  ;;  %v678_v23 = vmul.f32 0.00390625, %v641_v50 }
  0xaf   :  { %v664_v24 = vmul.f32 0.00390625, %v613_v22  ;;  %v863_v38 = vperm.slane %v671_v17, %v1419_v16 }
  0xb0   :  { %v876_v4 = vperm.slane %v678_v23, %v1396_v51 }
  0xb1   :  { %v850_v10 = vperm.slane %v664_v24, %v1459_v28  ;;  %v864_v25 = vsel %vm825_vm2, %v863_v38, %v862_v55 }
  0xb2   :  { %v877_v26 = vsel %vm821_vm1, %v876_v4, %v875_v6 }
  0xb3   :  { %v851_v27 = vsel %vm829_vm3, %v850_v10, %v849_v57  ;;  %778 = vmax.xlane.f32.xlu0 %v520_v37 }
  0xb4   :  { %v737_v34 = vpop.xlane.xlu1 %736 }
  0xb5   :  { %v749_v35 = vpop.xlane.xlu2 %748  ;;  %v945_v36 = vperm.slane %v737_v34, %v1396_v51  ;;  %v1535_v34 = vadd.s32 4294967240, %v1386_v46 }
  0xb6   :  { %v721_v39 = vpop.xlane.xlu0 %720  ;;  %v957_v14 = vperm.slane %v749_v35, %v1386_v46 }
  0xb7   :  { %v930_v40 = vperm.slane %v721_v39, %v1396_v51  ;;  %v946_v11 = vsel %vm821_vm1, %v945_v36, %v944_v3 }
  0xb9   :  { %v931_v12 = vsel %vm821_vm1, %v930_v40, %v929_v0 }
  0xbc   :  { %v599_v41 = vpop.xlane.xlu1 %598 }
  0xbd   :  { %v615_v42 = vpop.xlane.xlu2 %614  ;;  %v657_v43 = vmul.f32 0.00390625, %v599_v41 }
  0xbe   :  { %v751_v44 = vpop.xlane.xlu0 %750  ;;  %v665_v45 = vmul.f32 0.00390625, %v615_v42 }
  0xbf   :  { %v958_v47 = vperm.slane %v751_v44, %v1389_v48  ;;  %v832_v52 = vperm.slane %v657_v43, %v1485_v13 }
  0xc0   :  { %v852_v53 = vperm.slane %v665_v45, %v1485_v13 }
  0xc1   :  { %v959_v54 = vsel %vm817_vm0, %v958_v47, %v957_v14  ;;  %v834_v55 = vsel %vm833_vm4, %v832_v52, %v830_v15  ;;  %v1003_v52 = vld [vmem:[%s1646_s1 + $0x38] sm:$0xff] }
  0xc2   :  { %v853_v56 = vsel %vm833_vm4, %v852_v53, %v851_v27  ;;  %1022 = vmatpush.msra.mxu0 %v1003_v52 }
  0xc4   :  { %v643_v57 = vpop.xlane.xlu1 %642 }
  0xc5   :  { %v723_v18 = vpop.xlane.xlu2 %722  ;;  %v679_v19 = vmul.f32 0.00390625, %v643_v57  ;;  %v1002_v57 = vld [vmem:[%s1646_s1 + $0x30] sm:$0xff] }
  0xc6   :  { %v629_v58 = vpop.xlane.xlu0 %628  ;;  %v932_v59 = vperm.slane %v723_v18, %v1419_v16  ;;  %1023 = vmatpush.msra.mxu0 %v1002_v57 }
  0xc7   :  { %v672_v20 = vmul.f32 0.00390625, %v629_v58  ;;  %v878_v21 = vperm.slane %v679_v19, %v1419_v16  ;;  %v1001_v19 = vld [vmem:[%s1646_s1 + $0x28] sm:$0xff] }
  0xc8   :  { %v1497_v60 = vsel %vm825_vm2, %v932_v59, %v931_v12  ;;  %1024 = vmatpush.msra.mxu0 %v1001_v19 }
  0xc9   :  { %v865_v61 = vperm.slane %v672_v20, %v1459_v28  ;;  %v1501_v62 = vsel %vm825_vm2, %v878_v21, %v877_v26  ;;  %v1000_v20 = vld [vmem:[%s1646_s1 + $0x20] sm:$0xff]  ;;  %v999_v21 = vld [vmem:[%s1646_s1 + $0x18] sm:$0xff] }
  0xca   :  { %1025 = vmatpush.msra.mxu0 %v1000_v20 }
  0xcb   :  { %v866_v63 = vsel %vm829_vm3, %v865_v61, %v864_v25 }
  0xcc   :  { %v753_v0 = vpop.xlane.xlu1 %752  ;;  %1026 = vmatpush.msra.mxu0 %v999_v21 }
  0xcd   :  { %v765_v5 = vpop.xlane.xlu2 %764  ;;  %v960_v6 = vperm.slane %v753_v0, %v1396_v51 }
  0xce   :  { %v739_v29 = vpop.xlane.xlu0 %738  ;;  %v972_v33 = vperm.slane %v765_v5, %v1386_v46 }
  0xcf   :  { %v947_v30 = vperm.slane %v739_v29, %v1419_v16  ;;  %v1507_v31 = vsel %vm821_vm1, %v960_v6, %v959_v54  ;;  %v998_v29 = vld [vmem:[%s1646_s1 + $0x10] sm:$0xff] }
  0xd0   :  { %1027 = vmatpush.msra.mxu0 %v998_v29 }
  0xd1   :  { %v1510_v7 = vsel %vm825_vm2, %v947_v30, %v946_v11 }
  0xd4   :  { %v601_v8 = vpop.xlane.xlu1 %600 }
  0xd5   :  { %v617_v1 = vpop.xlane.xlu2 %616  ;;  %v658_v2 = vmul.f32 0.00390625, %v601_v8 }
  0xd6   :  { %v767_v9 = vpop.xlane.xlu0 %766  ;;  %v666_v3 = vmul.f32 0.00390625, %v617_v1  ;;  %v996_v1 = vld [vmem:[%s1646_s1] sm:$0xff] }
  0xd7   :  { %v973_v15 = vperm.slane %v767_v9, %v1389_v48  ;;  %v836_v49 = vperm.slane %v658_v2, %v1513_v32 }
  0xd8   :  { %v854_v50 = vperm.slane %v666_v3, %v1513_v32 }
  0xd9   :  { %v1520_v17 = vsel %vm817_vm0, %v973_v15, %v972_v33  ;;  %v838_v22 = vsel %vm837_vm5, %v836_v49, %v834_v55  ;;  %v997_v33 = vld [vmem:[%s1646_s1 + $0x8] sm:$0xff] }
  0xda   :  { %v855_v23 = vsel %vm837_vm5, %v854_v50, %v853_v56  ;;  %1028 = vmatpush.msra.mxu0 %v997_v33 }
  0xdc   :  { %v645_v24 = vpop.xlane.xlu1 %644  ;;  %1029 = vmatpush.msra.mxu0 %v996_v1 }
  0xdd   :  { %v1524_v37 = vpop.xlane.xlu2 %724  ;;  %v680_v30 = vmul.f32 0.00390625, %v645_v24 }
  0xde   :  { %v631_v38 = vpop.xlane.xlu0 %630 }
  0xdf   :  { %v673_v4 = vmul.f32 0.00390625, %v631_v38  ;;  %v880_v9 = vperm.slane %v680_v30, %v1459_v28 }
  0xe1   :  { %v867_v10 = vperm.slane %v673_v4, %v1485_v13  ;;  %v881_v24 = vsel %vm829_vm3, %v880_v9, %v1501_v62  ;;  %v1005_v9 = vld [vmem:[%s1648_s3] sm:$0xf] }
  0xe2   :  { %1108 = vmatpush.msk.msra.mxu1 %vm994_vm13, %v1005_v9 }
  0xe3   :  { %v868_v48 = vsel %vm833_vm4, %v867_v10, %v866_v63 }
  0xe4   :  { %v1528_v25 = vpop.xlane.xlu1 %754 }
  0xe5   :  { %v1530_v26 = vpop.xlane.xlu2 %768 }
  0xe6   :  { %v1532_v27 = vpop.xlane.xlu0 %740  ;;  %v975_v20 = vperm.slane %v1530_v26, %v1396_v51 }
  0xe7   :  { %v949_v38 = vperm.slane %v1532_v27, %v1459_v28 }
  0xe8   :  { %v976_v51 = vsel %vm821_vm1, %v975_v20, %v1520_v17 }
  0xec   :  { %v619_v35 = vpop.xlane.xlu1 %618 }
  0xed   :  { %v633_v36 = vpop.xlane.xlu2 %632  ;;  %v667_v39 = vmul.f32 0.00390625, %v619_v35 }
  0xee   :  { %v603_v40 = vpop.xlane.xlu0 %602  ;;  %v674_v47 = vmul.f32 0.00390625, %v633_v36 }
  0xef   :  { %v659_v11 = vmul.f32 0.00390625, %v603_v40  ;;  %v856_v12 = vperm.slane %v667_v39, %v1535_v34 }
  0xf0   :  { %v869_v54 = vperm.slane %v674_v47, %v1513_v32 }
  0xf1   :  { %v840_v14 = vperm.slane %v659_v11, %v1535_v34  ;;  %v857_v41 = vsel %vm841_vm6, %v856_v12, %v855_v23  ;;  %v950_v12 = vsel %vm829_vm3, %v949_v38, %v1510_v7  ;;  %v962_v7 = vperm.slane %v1528_v25, %v1419_v16 }
  0xf2   :  { %v870_v59 = vsel %vm837_vm5, %v869_v54, %v868_v48  ;;  %v934_v48 = vperm.slane %v1524_v37, %v1459_v28 }
  0xf3   :  { %v842_v42 = vsel %vm841_vm6, %v840_v14, %v838_v22 }
  0xf4   :  { %v889_v43 = vsel %vm888_vm7, %v857_v41, %v842_v42  ;;  %v1541_v44 = vpop.xlane.xlu1 %726  ;;  %v935_v37 = vsel %vm829_vm3, %v934_v48, %v1497_v60 }
  0xf5   :  { %v743_v46 = vpop.xlane.xlu2 %742  ;;  %v936_v39 = vperm.slane %v1541_v44, %v1485_v13 }
  0xf6   :  { %v647_v45 = vpop.xlane.xlu0 %646  ;;  %v951_v35 = vperm.slane %v743_v46, %v1485_v13 }
  0xf7   :  { %v681_v8 = vmul.f32 0.00390625, %v647_v45  ;;  %v937_v44 = vsel %vm833_vm4, %v936_v39, %v935_v37 }
  0xf8   :  { %v952_v41 = vsel %vm833_vm4, %v951_v35, %v950_v12 }
  0xf9   :  { %v882_v3 = vperm.slane %v681_v8, %v1485_v13 }
  0xfb   :  { %v883_v4 = vsel %vm833_vm4, %v882_v3, %v881_v24 }
  0xfc   :  { %v1546_v53 = vpop.xlane.xlu1 %770 }
  0xfd   :  { %v635_v55 = vpop.xlane.xlu2 %634 }
  0xfe   :  { %v1549_v56 = vpop.xlane.xlu0 %756  ;;  %v675_v18 = vmul.f32 0.00390625, %v635_v55 }
  0xff   :  { %v964_v54 = vperm.slane %v1549_v56, %v1459_v28 }
 0x100   :  { %v871_v58 = vperm.slane %v675_v18, %v1535_v34 }
 0x102   :  { %v872_v61 = vsel %vm841_vm6, %v871_v58, %v870_v59  ;;  %v963_v58 = vsel %vm825_vm2, %v962_v7, %v1507_v31 }
 0x103   :  { %v891_v63 = vsel %vm890_vm8, %v872_v61, %v889_v43  ;;  %v965_v59 = vsel %vm829_vm3, %v964_v54, %v963_v58 }
 0x104   :  { %v729_v0 = vpop.xlane.xlu1 %728 }
 0x105   :  { %v745_v5 = vpop.xlane.xlu2 %744  ;;  %v938_v27 = vperm.slane %v729_v0, %v1513_v32 }
 0x106   :  { %v649_v6 = vpop.xlane.xlu0 %648  ;;  %v953_v62 = vperm.slane %v745_v5, %v1513_v32 }
 0x107   :  { %v682_v2 = vmul.f32 0.00390625, %v649_v6  ;;  %v939_v52 = vsel %vm837_vm5, %v938_v27, %v937_v44 }
 0x108   :  { %v954_v46 = vsel %vm837_vm5, %v953_v62, %v952_v41 }
 0x109   :  { %v884_v49 = vperm.slane %v682_v2, %v1513_v32 }
 0x10b   :  { %v885_v36 = vsel %vm837_vm5, %v884_v49, %v883_v4  ;;  %v1116_v49 = vld [vmem:[%s1649_s4] ss:$0 sm:$0xff] }
 0x10c   :  { %v773_v15 = vpop.xlane.xlu1 %772 }
 0x10d   :  { %v651_v50 = vpop.xlane.xlu2 %650  ;;  %v979_v5 = vperm.slane %v773_v15, %v1459_v28 }
 0x10e   :  { %v759_v22 = vpop.xlane.xlu0 %758  ;;  %v683_v23 = vmul.f32 0.00390625, %v651_v50 }
 0x10f   :  { %v966_v57 = vperm.slane %v759_v22, %v1485_v13 }
 0x110   :  { %v886_v10 = vperm.slane %v683_v23, %v1535_v34 }
 0x111   :  { %v967_v21 = vsel %vm833_vm4, %v966_v57, %v965_v59 }
 0x112   :  { %v887_v40 = vsel %vm841_vm6, %v886_v10, %v885_v36 }
 0x113   :  { %v893_v11 = vsel %vm892_vm9, %v887_v40, %v891_v63  ;;  %v977_v63 = vperm.slane %v1546_v53, %v1419_v16 }
 0x114   :  { %v747_v14 = vpop.xlane.xlu1 %746 }
 0x115   :  { %v955_v42 = vperm.slane %v747_v14, %v1535_v34  ;;  %v761_v45 = vpop.xlane.xlu2 %760  ;;  %v978_v26 = vsel %vm825_vm2, %v977_v63, %v976_v51 }
 0x116   :  { %v731_v43 = vpop.xlane.xlu0 %730  ;;  %v968_v19 = vperm.slane %v761_v45, %v1513_v32  ;;  %v980_v33 = vsel %vm829_vm3, %v979_v5, %v978_v26  ;;  %vm1088_vm3 = vcmask 519168  }
 0x117   :  { %v940_v47 = vperm.slane %v731_v43, %v1535_v34  ;;  %v956_v60 = vsel %vm841_vm6, %v955_v42, %v954_v46 }
 0x118   :  { %v969_v0 = vsel %vm837_vm5, %v968_v19, %v967_v21 }
 0x119   :  { %v941_v55 = vsel %vm841_vm6, %v940_v47, %v939_v52 }
 0x11a   :  { %v988_v18 = vsel %vm987_vm10, %v956_v60, %v941_v55 }
 0x11c   :  { %v763_v25 = vpop.xlane.xlu1 %762 }
 0x11d   :  { %v970_v56 = vperm.slane %v763_v25, %v1535_v34  ;;  %v777_v29 = vpop.xlane.xlu2 %776 }
 0x11e   :  { %v775_v61 = vpop.xlane.xlu0 %774  ;;  %v983_v8 = vperm.slane %v777_v29, %v1513_v32  ;;  %v1115_v32 = vld [vmem:[%s1647_s2] ss:$0 sm:$0xff]  ;;  %s1176_s2 = smov [#allocation7]  }
 0x11f   :  { %v971_v31 = vsel %vm841_vm6, %v970_v56, %v969_v0  ;;  %v981_v6 = vperm.slane %v775_v61, %v1485_v13  ;;  %s1095_s3 = sshll.u32 %s1176_s2, 4  ;;  %s1096_s3 = int_to_ptr.vmem [resolvable:$true] %s1095_s3 }
 0x120   :  { %v990_v30 = vsel %vm989_vm11, %v971_v31, %v988_v18 }
 0x121   :  { %v982_v16 = vsel %vm833_vm4, %v981_v6, %v980_v33 }
 0x122   :  { %v984_v1 = vsel %vm837_vm5, %v983_v8, %v982_v16 }
 0x126   :  { %v779_v53 = vpop.xlane.xlu0 %778 }
 0x127   :  { %v985_v28 = vperm.slane %v779_v53, %v1535_v34 }
 0x129   :  { %v986_v13 = vsel %vm841_vm6, %v985_v28, %v984_v1 }
 0x12a   :  { %v992_v2 = vsel %vm991_vm12, %v986_v13, %v990_v30 }
 0x12b   :  { %v995_v17 = vsel %vm994_vm13, %v893_v11, %v992_v2 }
 0x12c   :  { %1107 = vmatmul.msk.f32.vlgmr.msra.gmra.mxu0 %vm1010_vm14, %v995_v17 }
 0x1a9   :  { %v1031_v34 = vpop.f32.mrf.mxu0 }
 0x1aa   :  { %v1032_v3 = vadd.f32 %v1115_v32, %v1031_v34 }
 0x1ac   :  { %v1034_v15 = vmax.f32 %v1032_v3, 0.0 }
 0x1ae   :  { %1109 = vmatmul.msk.f32.vlgmr.msra.gmra.mxu1 %vm1038_vm15, %v1034_v15 }
 0x22b   :  { %v1062_v50 = vpop.f32.mrf.mxu1 }
 0x22c   :  { %v1063_v22 = vadd.f32 %v1116_v49, %v1062_v50 }
 0x22e   :  { %v1066_v23 = vrot.slane %v1063_v22, 4 }
 0x230   :  { %v1068_v24 = vadd.f32 %v1066_v23, %v1063_v22 }
 0x232   :  { %v1110_v38 = vmul.f32 -1.442695, %v1068_v24 }
 0x234   :  { %1117 = vpow2.f32 %v1110_v38 }
 0x23a   :  { %v1118_v4 = vpop.eup %1117 }
 0x23b   :  { %v1072_v10 = vadd.f32 1.0, %v1118_v4 }
 0x23d   :  { %1119 = vrcp.f32 %v1072_v10  ;;  %v1084_v39 = vand.u32 2147483648, %v1072_v10  ;;  %v1082_v40 = vand.u32 2147483647, %v1072_v10  ;;  %vm1078_vm1 = vweird.f32 %v1072_v10 }
 0x23f   :  { %v1085_v11 = vor.u32 1.1754944e-38, %v1084_v39  ;;  %vm1083_vm4 = vcmp.eq.f32.partialorder %v1082_v40, 8.507059e+37 }
 0x243   :  { %v1120_v48 = vpop.eup %1119 }
 0x244   :  { %v1074_v35 = vmul.f32 %v1120_v48, %v1072_v10  ;;  %vm1079_vm0 = vweird.f32 %v1120_v48 }
 0x245   :  { %vm1080_vm2 = vmor %vm1078_vm1, %vm1079_vm0 }
 0x246   :  { %v1075_v36 = vsub.f32 1.0, %v1074_v35 }
 0x248   :  { %v1076_v62 = vmul.f32 %v1120_v48, %v1075_v36 }
 0x24a   :  { %v1077_v27 = vadd.f32 %v1120_v48, %v1076_v62 }
 0x24c   :  { %v1081_v12 = vsel %vm1080_vm2, %v1120_v48, %v1077_v27 }
 0x24d   :  { %v1086_v14 = vsel %vm1083_vm4, %v1085_v11, %v1081_v12 }
 0x24e   :  { %1089 = vst.msk [vmem:[#allocation7] sm:$0xf] %vm1088_vm3, %v1086_v14 }
 0x24f   :  { %1100 = dma.vmem_to_hbm [thread:$0]  %s1096_s3, 64, %s1098_s21, [#allocation6]  }
 0x250   :  { %1171 = dma.done.wait [#allocation6], 64  }
 0x251   :  { %1172 = vsyncadd [#allocation6], 4294967232 }
 0x252   :  { %1105 = vsyncpa [#allocation5], 1 }
 0x253   :  { %1106 = vsyncpa [#allocation6], 1 }

</bundles_post_ra>
